<compile_context>
chip_gen: v7x
topology: tpu7x:2x2x1
jax: 0.10.0
libtpu: 0.0.40
codegen_flags: <defaults>
</compile_context>

<pallas_src>
import jax
import jax.numpy as jnp
from jax.experimental import pallas as pl
from jax.experimental.pallas import tpu as pltpu


def contextnet_kernel(x_ref,        # (tb, Np)   f32   packed flattened input
                      we_ref,       # (Np, FHp)  bf16  block-diag excite weight
                      be_ref,       # (1, FHp)   f32   excite bias (tiled)
                      ws_ref,       # (FHp, Np)  bf16  squeeze-excite weight (block-diag per packed row)
                      bs_ref,       # (1, Np)    f32   squeeze-excite bias
                      wc_ref,       # (Np, Np)   bf16  block-diag contextnet weight
                      bc_ref,       # (1, Np)    f32   contextnet bias (tiled)
                      red_ref,      # (Np, Fp)   f32   per-field mean reducer (1/D entries)
                      bcast_ref,    # (Fp, Np)   f32   per-field broadcaster (ones)
                      g_ref,        # (1, Np)    f32   LayerNorm gamma (tiled)
                      bt_ref,       # (1, Np)    f32   LayerNorm beta (tiled)
                      o_ref):       # (tb, Np)   output block
    x = x_ref[...].astype(jnp.float32)                       # (tb, Np)
    cd = we_ref.dtype                                         # matmul compute dtype

    # ---- context_embedding_fn ----
    # excite: shared per-field linear D->H as one lane-dense block-diag matmul.
    o1 = jnp.dot(x.astype(cd), we_ref[...],
                 preferred_element_type=jnp.float32) + be_ref[...]       # (tb, FHp)
    # squeeze-excite: mixes fields within each original batch row.
    ce = jnp.dot(o1.astype(cd), ws_ref[...],
                 preferred_element_type=jnp.float32) + bs_ref[...]       # (tb, Np)

    # ---- contextnet_block_fn (single block, point_fnn_tag=False) ----
    merge = x * ce                                                        # f32
    hidden = jnp.dot(merge.astype(cd), wc_ref[...],
                     preferred_element_type=jnp.float32) + bc_ref[...]   # (tb, Np)

    # Per-field LayerNorm over dim (eps=1e-5), two-pass statistics.
    # Segmented mean via a tiny (Np x Fp) reduce matmul + (Fp x Np) broadcast
    # matmul: no reshapes, no XLU reductions, negligible MXU FLOPs.
    mean = jnp.dot(jnp.dot(hidden, red_ref[...],
                           preferred_element_type=jnp.float32),
                   bcast_ref[...], preferred_element_type=jnp.float32)
    centered = hidden - mean
    var = jnp.dot(jnp.dot(centered * centered, red_ref[...],
                          preferred_element_type=jnp.float32),
                  bcast_ref[...], preferred_element_type=jnp.float32)
    out = centered * jax.lax.rsqrt(var + 1e-5) * g_ref[...] + bt_ref[...]

    o_ref[...] = out.astype(o_ref.dtype)


_VMEM_BUDGET = 40 * 1024 * 1024          # conservative across v5e/v6e/v7x


def _packing_factor(N, B):
    """How many batch rows to pack per vreg row (lane-dense output)."""
    if N >= 128:
        return 1
    for r in range(128 // N, 0, -1):     # prefer full 128-lane packing
        if B % r == 0:
            return r
    return 1


def _choose_row_tile(rows, max_tile_rows, min_grid=2):
    """Multiple-of-8 row tile within the VMEM budget; keep >=2 grid steps
    when there is enough work so both v7x TensorCores get a block."""
    tile = min(rows, max_tile_rows)
    if rows >= 16 * min_grid:
        tile = min(tile, -(-rows // min_grid))
    tile = max(8, (tile // 8) * 8)
    return tile


def contextnet_block_layer(x, params, *, compute_dtype=jnp.bfloat16,
                           out_dtype=None, row_tile=None):
    """x: (B, F, D) -> (B, F*D)."""
    B, F, D = x.shape
    we, be, ws, bs, wc, bc, gamma, beta = params
    H = we.shape[1]
    N = F * D
    out_dtype = out_dtype or x.dtype

    # --- wrapper-side layout plumbing (done once, outside the kernel) ---
    r = _packing_factor(N, B)            # rows packed per lane-dense row
    Fp = r * F                           # fields per packed row
    Np = Fp * D                          # packed feature width  (>=128 when possible)
    FHp = Fp * H

    eye_fp = jnp.eye(Fp, dtype=jnp.float32)
    eye_r = jnp.eye(r, dtype=jnp.float32)
    we_bd = jnp.kron(eye_fp, we).astype(compute_dtype)              # (Np, FHp)
    wc_bd = jnp.kron(eye_fp, wc).astype(compute_dtype)              # (Np, Np)
    ws_bd = jnp.kron(eye_r, ws).astype(compute_dtype)               # (FHp, Np)
    be_t = jnp.tile(be, (1, Fp))                                    # (1, FHp)
    bs_t = jnp.tile(bs, (1, r))                                     # (1, Np)
    bc_t = jnp.tile(bc, (1, Fp))                                    # (1, Np)
    g_t = jnp.tile(gamma, (1, Fp))                                  # (1, Np)
    bt_t = jnp.tile(beta, (1, Fp))                                  # (1, Np)
    # LayerNorm segmented-mean reduce / broadcast matrices (tiny, f32-exact).
    red = jnp.kron(eye_fp, jnp.full((D, 1), 1.0 / D, jnp.float32))  # (Np, Fp)
    bcast = jnp.kron(eye_fp, jnp.ones((1, D), jnp.float32))         # (Fp, Np)

    rows = B // r
    x2 = x.reshape(rows, Np)             # contiguous row-major pack, free

    consts = (we_bd, be_t, ws_bd, bs_t, wc_bd, bc_t, red, bcast, g_t, bt_t)
    weight_bytes = sum(int(a.size) * a.dtype.itemsize for a in consts)

    # Per-row VMEM: double-buffered input/output tiles + f32 working set.
    out_isz = jnp.dtype(out_dtype).itemsize
    per_row = 2 * Np * 4 + 2 * Np * out_isz + (10 * Np + 3 * FHp) * 4
    avail = max(_VMEM_BUDGET - 2 * weight_bytes, 8 * per_row)
    max_tile_rows = avail // per_row

    tile = row_tile or _choose_row_tile(rows, max_tile_rows)
    padded_rows = -(-rows // tile) * tile
    if padded_rows != rows:
        x2 = jnp.pad(x2, ((0, padded_rows - rows), (0, 0)))
    grid = (padded_rows // tile,)

    vmem_need = 2 * weight_bytes + tile * per_row
    vmem_limit = int(min(max(vmem_need * 1.25, 32 * 1024 * 1024),
                         56 * 1024 * 1024))

    # Advisory cost hint so XLA overlaps this call with surrounding ops.
    flops = 2 * padded_rows * (2 * Np * FHp + Np * Np + 4 * Np * Fp)
    bytes_accessed = padded_rows * Np * (4 + out_isz) + weight_bytes
    cost = pl.CostEstimate(flops=int(flops),
                           transcendentals=int(padded_rows * Np),
                           bytes_accessed=int(bytes_accessed))

    full = lambda shape: pl.BlockSpec(shape, lambda b: (0, 0))

    out = pl.pallas_call(
        contextnet_kernel,
        out_shape=jax.ShapeDtypeStruct((padded_rows, Np), out_dtype),
        grid_spec=pltpu.PrefetchScalarGridSpec(
            num_scalar_prefetch=0,
            grid=grid,
            in_specs=[
                pl.BlockSpec((tile, Np), lambda b: (b, 0)),   # packed input
                full((Np, FHp)), full((1, FHp)),              # excite W (block-diag), b
                full((FHp, Np)), full((1, Np)),               # squeeze-excite W, b
                full((Np, Np)), full((1, Np)),                # contextnet W (block-diag), b
                full((Np, Fp)), full((Fp, Np)),               # LN reduce / broadcast
                full((1, Np)), full((1, Np)),                 # LN gamma, beta
            ],
            out_specs=pl.BlockSpec((tile, Np), lambda b: (b, 0)),
        ),
        compiler_params=pltpu.CompilerParams(
            dimension_semantics=("parallel",),
            vmem_limit_bytes=vmem_limit),
        cost_estimate=cost,
    )(x2, *consts)

    return out[:rows].reshape(B, N)


def make_params(key, fields, in_shape, hidden_size):
    """Deterministic synthetic parameters (xavier-normal weights, small biases)."""
    k = jax.random.split(key, 6)

    def xavier(kk, shape):
        fan_in, fan_out = shape[0], shape[1]
        std = (2.0 / (fan_in + fan_out)) ** 0.5
        return jax.random.normal(kk, shape, jnp.float32) * std

    we = xavier(k[0], (in_shape, hidden_size))                       # excite (D, H)
    be = jax.random.uniform(k[1], (1, hidden_size), jnp.float32, -0.1, 0.1)
    ws = xavier(k[2], (fields * hidden_size, fields * in_shape))     # se (F*H, F*D)
    bs = jax.random.uniform(k[3], (1, fields * in_shape), jnp.float32, -0.1, 0.1)
    wc = xavier(k[4], (in_shape, in_shape))                          # block (D, D)
    bc = jax.random.uniform(k[5], (1, in_shape), jnp.float32, -0.1, 0.1)
    gamma = jnp.ones((1, in_shape), jnp.float32)                     # LayerNorm defaults
    beta = jnp.zeros((1, in_shape), jnp.float32)
    return (we, be, ws, bs, wc, bc, gamma, beta)


def reference(x, params, compute_dtype=jnp.bfloat16):
    """Plain-JAX reference of the PyTorch forward (mirrors bf16 matmul inputs)."""
    we, be, ws, bs, wc, bc, gamma, beta = params
    B, F, D = x.shape
    cd = compute_dtype
    o1 = jnp.einsum('bfd,dh->bfh', x.astype(cd), we.astype(cd),
                    preferred_element_type=jnp.float32) + be
    o1 = o1.reshape(B, -1)
    ce = jnp.dot(o1.astype(cd), ws.astype(cd),
                 preferred_element_type=jnp.float32) + bs
    ce = ce.reshape(B, F, D)
    merge = x * ce
    h = jnp.einsum('bfd,de->bfe', merge.astype(cd), wc.astype(cd),
                   preferred_element_type=jnp.float32) + bc
    mu = h.mean(-1, keepdims=True)
    var = ((h - mu) ** 2).mean(-1, keepdims=True)
    out = (h - mu) * jax.lax.rsqrt(var + 1e-5) * gamma + beta
    return out.reshape(B, F * D)


if __name__ == "__main__":
    batch, fields, in_shape, hidden_size = 256, 4, 16, 32

    key = jax.random.PRNGKey(0)
    kx, kp = jax.random.split(key)
    x = jax.random.normal(kx, (batch, fields, in_shape), jnp.float32)
    params = make_params(kp, fields, in_shape, hidden_size)

    # N = 64 -> rows packed 2-at-a-time into a 128-lane layout;
    # 128 packed rows split into 2 grid steps of 64 (both v7x cores busy).
    out = contextnet_block_layer(x, params)
    out = jax.block_until_ready(out)

    ref = reference(x, params)
    assert out.shape == (batch, fields * in_shape)
    err = float(jnp.max(jnp.abs(out - ref)))
    assert jnp.allclose(out, ref, atol=2e-3, rtol=2e-3), f"max abs err {err}"

    print("KERNEL_OK")
</pallas_src>

<mosaic_0001>
module attributes {stable_mosaic.version = 11 : i64} {
  func.func @contextnet_kernel(%arg0: i32, %arg1: memref<64x128xf32, #tpu.memory_space<vmem>>, %arg2: memref<128x256xbf16, #tpu.memory_space<vmem>>, %arg3: memref<1x256xf32, #tpu.memory_space<vmem>>, %arg4: memref<256x128xbf16, #tpu.memory_space<vmem>>, %arg5: memref<1x128xf32, #tpu.memory_space<vmem>>, %arg6: memref<128x128xbf16, #tpu.memory_space<vmem>>, %arg7: memref<1x128xf32, #tpu.memory_space<vmem>>, %arg8: memref<128x8xf32, #tpu.memory_space<vmem>>, %arg9: memref<8x128xf32, #tpu.memory_space<vmem>>, %arg10: memref<1x128xf32, #tpu.memory_space<vmem>>, %arg11: memref<1x128xf32, #tpu.memory_space<vmem>>, %arg12: memref<64x128xf32, #tpu.memory_space<vmem>>) attributes {dimension_semantics = [#tpu.dimension_semantics<parallel>], iteration_bounds = array<i64: 2>, scalar_prefetch = 0 : i64, scratch_operands = 0 : i64, tpu.core_type = #tpu.core_type<tc>, window_params = [{transform_indices = @transform_0, window_bounds = array<i64: 64, 128>}, {pipeline_mode = #tpu.pipeline_mode<synchronous>, transform_indices = @transform_1, window_bounds = array<i64: 128, 256>}, {pipeline_mode = #tpu.pipeline_mode<synchronous>, transform_indices = @transform_2, window_bounds = array<i64: 1, 256>}, {pipeline_mode = #tpu.pipeline_mode<synchronous>, transform_indices = @transform_3, window_bounds = array<i64: 256, 128>}, {pipeline_mode = #tpu.pipeline_mode<synchronous>, transform_indices = @transform_4, window_bounds = array<i64: 1, 128>}, {pipeline_mode = #tpu.pipeline_mode<synchronous>, transform_indices = @transform_5, window_bounds = array<i64: 128, 128>}, {pipeline_mode = #tpu.pipeline_mode<synchronous>, transform_indices = @transform_6, window_bounds = array<i64: 1, 128>}, {pipeline_mode = #tpu.pipeline_mode<synchronous>, transform_indices = @transform_7, window_bounds = array<i64: 128, 8>}, {pipeline_mode = #tpu.pipeline_mode<synchronous>, transform_indices = @transform_8, window_bounds = array<i64: 8, 128>}, {pipeline_mode = #tpu.pipeline_mode<synchronous>, transform_indices = @transform_9, window_bounds = array<i64: 1, 128>}, {pipeline_mode = #tpu.pipeline_mode<synchronous>, transform_indices = @transform_10, window_bounds = array<i64: 1, 128>}, {transform_indices = @transform_11, window_bounds = array<i64: 64, 128>}]} {
    %c0 = arith.constant 0 : index
    %c0_0 = arith.constant 0 : index
    %0 = vector.load %arg1[%c0, %c0_0] : memref<64x128xf32, #tpu.memory_space<vmem>>, vector<64x128xf32>
    %1 = arith.truncf %0 : vector<64x128xf32> to vector<64x128xbf16>
    %c0_1 = arith.constant 0 : index
    %c0_2 = arith.constant 0 : index
    %2 = vector.load %arg2[%c0_1, %c0_2] : memref<128x256xbf16, #tpu.memory_space<vmem>>, vector<128x256xbf16>
    %cst = arith.constant dense<0.000000e+00> : vector<64x256xf32>
    %3 = tpu.matmul %1, %2, %cst {dimension_numbers = #tpu.dot_dimension_numbers<[1], [0], [0], [1], [0, 0, 1, 1], [], []>} : vector<64x128xbf16>, vector<128x256xbf16>, vector<64x256xf32> -> vector<64x256xf32>
    %c0_3 = arith.constant 0 : index
    %c0_4 = arith.constant 0 : index
    %4 = vector.load %arg3[%c0_3, %c0_4] : memref<1x256xf32, #tpu.memory_space<vmem>>, vector<1x256xf32>
    %5 = vector.broadcast %4 : vector<1x256xf32> to vector<64x256xf32>
    %6 = arith.addf %3, %5 : vector<64x256xf32>
    %7 = arith.truncf %6 : vector<64x256xf32> to vector<64x256xbf16>
    %c0_5 = arith.constant 0 : index
    %c0_6 = arith.constant 0 : index
    %8 = vector.load %arg4[%c0_5, %c0_6] : memref<256x128xbf16, #tpu.memory_space<vmem>>, vector<256x128xbf16>
    %cst_7 = arith.constant dense<0.000000e+00> : vector<64x128xf32>
    %9 = tpu.matmul %7, %8, %cst_7 {dimension_numbers = #tpu.dot_dimension_numbers<[1], [0], [0], [1], [0, 0, 1, 1], [], []>} : vector<64x256xbf16>, vector<256x128xbf16>, vector<64x128xf32> -> vector<64x128xf32>
    %c0_8 = arith.constant 0 : index
    %c0_9 = arith.constant 0 : index
    %10 = vector.load %arg5[%c0_8, %c0_9] : memref<1x128xf32, #tpu.memory_space<vmem>>, vector<1x128xf32>
    %11 = vector.broadcast %10 : vector<1x128xf32> to vector<64x128xf32>
    %12 = arith.addf %9, %11 : vector<64x128xf32>
    %13 = arith.mulf %0, %12 : vector<64x128xf32>
    %14 = arith.truncf %13 : vector<64x128xf32> to vector<64x128xbf16>
    %c0_10 = arith.constant 0 : index
    %c0_11 = arith.constant 0 : index
    %15 = vector.load %arg6[%c0_10, %c0_11] : memref<128x128xbf16, #tpu.memory_space<vmem>>, vector<128x128xbf16>
    %cst_12 = arith.constant dense<0.000000e+00> : vector<64x128xf32>
    %16 = tpu.matmul %14, %15, %cst_12 {dimension_numbers = #tpu.dot_dimension_numbers<[1], [0], [0], [1], [0, 0, 1, 1], [], []>} : vector<64x128xbf16>, vector<128x128xbf16>, vector<64x128xf32> -> vector<64x128xf32>
    %c0_13 = arith.constant 0 : index
    %c0_14 = arith.constant 0 : index
    %17 = vector.load %arg7[%c0_13, %c0_14] : memref<1x128xf32, #tpu.memory_space<vmem>>, vector<1x128xf32>
    %18 = vector.broadcast %17 : vector<1x128xf32> to vector<64x128xf32>
    %19 = arith.addf %16, %18 : vector<64x128xf32>
    %c0_15 = arith.constant 0 : index
    %c0_16 = arith.constant 0 : index
    %20 = vector.load %arg8[%c0_15, %c0_16] : memref<128x8xf32, #tpu.memory_space<vmem>>, vector<128x8xf32>
    %cst_17 = arith.constant dense<0.000000e+00> : vector<64x8xf32>
    %21 = tpu.matmul %19, %20, %cst_17 {dimension_numbers = #tpu.dot_dimension_numbers<[1], [0], [0], [1], [0, 0, 1, 1], [], []>} : vector<64x128xf32>, vector<128x8xf32>, vector<64x8xf32> -> vector<64x8xf32>
    %c0_18 = arith.constant 0 : index
    %c0_19 = arith.constant 0 : index
    %22 = vector.load %arg9[%c0_18, %c0_19] : memref<8x128xf32, #tpu.memory_space<vmem>>, vector<8x128xf32>
    %cst_20 = arith.constant dense<0.000000e+00> : vector<64x128xf32>
    %23 = tpu.matmul %21, %22, %cst_20 {dimension_numbers = #tpu.dot_dimension_numbers<[1], [0], [0], [1], [0, 0, 1, 1], [], []>} : vector<64x8xf32>, vector<8x128xf32>, vector<64x128xf32> -> vector<64x128xf32>
    %24 = arith.subf %19, %23 : vector<64x128xf32>
    %25 = arith.mulf %24, %24 : vector<64x128xf32>
    %c0_21 = arith.constant 0 : index
    %c0_22 = arith.constant 0 : index
    %26 = vector.load %arg8[%c0_21, %c0_22] : memref<128x8xf32, #tpu.memory_space<vmem>>, vector<128x8xf32>
    %cst_23 = arith.constant dense<0.000000e+00> : vector<64x8xf32>
    %27 = tpu.matmul %25, %26, %cst_23 {dimension_numbers = #tpu.dot_dimension_numbers<[1], [0], [0], [1], [0, 0, 1, 1], [], []>} : vector<64x128xf32>, vector<128x8xf32>, vector<64x8xf32> -> vector<64x8xf32>
    %c0_24 = arith.constant 0 : index
    %c0_25 = arith.constant 0 : index
    %28 = vector.load %arg9[%c0_24, %c0_25] : memref<8x128xf32, #tpu.memory_space<vmem>>, vector<8x128xf32>
    %cst_26 = arith.constant dense<0.000000e+00> : vector<64x128xf32>
    %29 = tpu.matmul %27, %28, %cst_26 {dimension_numbers = #tpu.dot_dimension_numbers<[1], [0], [0], [1], [0, 0, 1, 1], [], []>} : vector<64x8xf32>, vector<8x128xf32>, vector<64x128xf32> -> vector<64x128xf32>
    %cst_27 = arith.constant 9.99999974E-6 : f32
    %30 = vector.broadcast %cst_27 : f32 to vector<64x128xf32>
    %31 = arith.addf %29, %30 : vector<64x128xf32>
    %32 = math.rsqrt %31 : vector<64x128xf32>
    %33 = arith.mulf %24, %32 : vector<64x128xf32>
    %c0_28 = arith.constant 0 : index
    %c0_29 = arith.constant 0 : index
    %34 = vector.load %arg10[%c0_28, %c0_29] : memref<1x128xf32, #tpu.memory_space<vmem>>, vector<1x128xf32>
    %35 = vector.broadcast %34 : vector<1x128xf32> to vector<64x128xf32>
    %36 = arith.mulf %33, %35 : vector<64x128xf32>
    %c0_30 = arith.constant 0 : index
    %c0_31 = arith.constant 0 : index
    %37 = vector.load %arg11[%c0_30, %c0_31] : memref<1x128xf32, #tpu.memory_space<vmem>>, vector<1x128xf32>
    %38 = vector.broadcast %37 : vector<1x128xf32> to vector<64x128xf32>
    %39 = arith.addf %36, %38 : vector<64x128xf32>
    %c0_32 = arith.constant 0 : index
    %c0_33 = arith.constant 0 : index
    %40 = vector.load %arg12[%c0_32, %c0_33] : memref<64x128xf32, #tpu.memory_space<vmem>>, vector<64x128xf32>
    tpu.vector_store %arg12[%c0_32, %c0_33], %39 {strides = array<i32>} : memref<64x128xf32, #tpu.memory_space<vmem>>, vector<64x128xf32>,
    return
  }
  func.func @transform_0(%arg0: i32) -> (i32, i32) {
    %c0_i32 = arith.constant 0 : i32
    %c0_i32_0 = arith.constant 0 : i32
    return %arg0, %c0_i32 : i32, i32
  }
  func.func @transform_1(%arg0: i32) -> (i32, i32) {
    %c0_i32 = arith.constant 0 : i32
    %c0_i32_0 = arith.constant 0 : i32
    %c0_i32_1 = arith.constant 0 : i32
    return %c0_i32, %c0_i32_0 : i32, i32
  }
  func.func @transform_2(%arg0: i32) -> (i32, i32) {
    %c0_i32 = arith.constant 0 : i32
    %c0_i32_0 = arith.constant 0 : i32
    %c0_i32_1 = arith.constant 0 : i32
    return %c0_i32, %c0_i32_0 : i32, i32
  }
  func.func @transform_3(%arg0: i32) -> (i32, i32) {
    %c0_i32 = arith.constant 0 : i32
    %c0_i32_0 = arith.constant 0 : i32
    %c0_i32_1 = arith.constant 0 : i32
    return %c0_i32, %c0_i32_0 : i32, i32
  }
  func.func @transform_4(%arg0: i32) -> (i32, i32) {
    %c0_i32 = arith.constant 0 : i32
    %c0_i32_0 = arith.constant 0 : i32
    %c0_i32_1 = arith.constant 0 : i32
    return %c0_i32, %c0_i32_0 : i32, i32
  }
  func.func @transform_5(%arg0: i32) -> (i32, i32) {
    %c0_i32 = arith.constant 0 : i32
    %c0_i32_0 = arith.constant 0 : i32
    %c0_i32_1 = arith.constant 0 : i32
    return %c0_i32, %c0_i32_0 : i32, i32
  }
  func.func @transform_6(%arg0: i32) -> (i32, i32) {
    %c0_i32 = arith.constant 0 : i32
    %c0_i32_0 = arith.constant 0 : i32
    %c0_i32_1 = arith.constant 0 : i32
    return %c0_i32, %c0_i32_0 : i32, i32
  }
  func.func @transform_7(%arg0: i32) -> (i32, i32) {
    %c0_i32 = arith.constant 0 : i32
    %c0_i32_0 = arith.constant 0 : i32
    %c0_i32_1 = arith.constant 0 : i32
    return %c0_i32, %c0_i32_0 : i32, i32
  }
  func.func @transform_8(%arg0: i32) -> (i32, i32) {
    %c0_i32 = arith.constant 0 : i32
    %c0_i32_0 = arith.constant 0 : i32
    %c0_i32_1 = arith.constant 0 : i32
    return %c0_i32, %c0_i32_0 : i32, i32
  }
  func.func @transform_9(%arg0: i32) -> (i32, i32) {
    %c0_i32 = arith.constant 0 : i32
    %c0_i32_0 = arith.constant 0 : i32
    %c0_i32_1 = arith.constant 0 : i32
    return %c0_i32, %c0_i32_0 : i32, i32
  }
  func.func @transform_10(%arg0: i32) -> (i32, i32) {
    %c0_i32 = arith.constant 0 : i32
    %c0_i32_0 = arith.constant 0 : i32
    %c0_i32_1 = arith.constant 0 : i32
    return %c0_i32, %c0_i32_0 : i32, i32
  }
  func.func @transform_11(%arg0: i32) -> (i32, i32) {
    %c0_i32 = arith.constant 0 : i32
    %c0_i32_0 = arith.constant 0 : i32
    return %arg0, %c0_i32 : i32, i32
  }
}

</mosaic_0001>

<bundles_post_ra>
// kernel: tpu_custom_call.1
= control target key start
LH: loop header
LB: loop body
LE: loop exit
PB: predicated region body
PF: predicated region fallthrough
CT: control target
= control target key end

     0   :  { %s2837_s0 = inlined_call_operand.vmem [shape: f32[128,128], index: 0, kind: input, shape index: {}]   ;;  %s2838_s1 = inlined_call_operand.hbm [shape: bf16[128,256], index: 1, kind: input, shape index: {}]   ;;  %s2839_s2 = inlined_call_operand.vmem [shape: f32[1,256], index: 2, kind: input, shape index: {}]   ;;  %s2840_s3 = inlined_call_operand.hbm [shape: bf16[256,128], index: 3, kind: input, shape index: {}]   ;;  %s2841_s4 = inlined_call_operand.vmem [shape: f32[1,128], index: 4, kind: input, shape index: {}]   ;;  %s2842_s5 = inlined_call_operand.hbm [shape: bf16[128,128], index: 5, kind: input, shape index: {}]   ;;  %s2843_s6 = inlined_call_operand.vmem [shape: f32[1,128], index: 6, kind: input, shape index: {}]   ;;  %s2844_s7 = inlined_call_operand.vmem [shape: f32[128,8], index: 7, kind: input, shape index: {}]   ;;  %s2845_s8 = inlined_call_operand.vmem [shape: f32[8,128], index: 8, kind: input, shape index: {}]   ;;  %s2846_s9 = inlined_call_operand.vmem [shape: f32[1,128], index: 9, kind: input, shape index: {}]   ;;  %s2847_s10 = inlined_call_operand.vmem [shape: f32[1,128], index: 10, kind: input, shape index: {}]   ;;  %s2848_s11 = inlined_call_operand.hbm [shape: f32[128,128], index: 11, kind: output, shape index: {}]  }
   0x1   :  { %2860 = sst [smem:[#allocation18_spill]] %s2840_s3 }
   0x2   :  { %16 = vsyncpa [#allocation3], 0 }
   0x3   :  { %17 = vsyncpa [#allocation6], 0 }
   0x4   :  { %18 = vsyncpa [#allocation4], 0 }
   0x5   :  { %20 = vsyncpa [#allocation4 + $0x1], 0  ;;  %s2414_s17 = smov 0   ;;  %s2416_s18 = smov 0  }
   0x6   :  { %s2418_s19 = smov 0   ;;  %s2420_s20 = smov 0  }
   0x7 LB: > { %2861 = sst [smem:[#allocation12_spill]] %s2329_s17  ;;  %s2435_s21 = sadd.s32 4294967295, %s2341_s20   ;;  %s2341_s20 = sphi %s2420_s20, %s2885_s20   ;;  %s2337_s19 = sphi %s2418_s19, %s2887_s19   ;;  %s2333_s18 = sphi %s2416_s18, %s2889_s18   ;;  %s2329_s17 = sphi %s2414_s17, %s2888_s17  }
   0x8   : > { %2862 = sst [smem:[#allocation13_spill]] %s2337_s19  ;;  %s1645_s22 = sadd.s32 4294967294, %s2341_s20  }
   0x9   : > { %2863 = sst [smem:[#allocation14_spill]] %s2341_s20  ;;  %s2439_s23 = sadd.s32 1, %s2341_s20  }
   0xa   : > { %2864 = sst [smem:[#allocation15_spill]] %s2439_s23  ;;  %s269_s24 = sadd.s32 1, %s2337_s19 }
   0xb   : > { %s266_s25 = ssub.s32 %s2341_s20, %s2439_s23  ;;  %p279_p0 = scmp.ne.s32.totalorder %s2337_s19, %s2333_s18 }
   0xc   : > { %p267_p1 = scmp.eq.s32.totalorder %s266_s25, 0  ;;  %p280_p2 = scmp.eq.s32.totalorder %s2435_s21, 1 }
   0xd   : > { %p285_p3 = scmp.ne.s32.totalorder %s2333_s18, %s2329_s17  ;;  %p286_p4 = scmp.eq.s32.totalorder %s1645_s22, 1 }
   0xe   : > { %s2450_s26 = scalar_select %p267_p1, %s2337_s19, %s269_s24  }
   0xf   : > { %p2452_p5 = por %p280_p2, %p279_p0  ;;  %p2456_p6 = por %p286_p4, %p285_p3 }
  0x10   : > { %2865 = sst [smem:[#allocation16_spill]] %s2450_s26  ;;  %p1646_p7 = scmp.ge.s32.totalorder %s2341_s20, 1 }
  0x11   : > { %s2866_s27 = scalar_select %p2452_p5, 1, 0 }
  0x12   : > { %s2867_s28 = scalar_select %p2456_p6, 1, 0 }
  0x13   : > { %p293_p8 = scmp.lt.s32.totalorder %s2341_s20, 3  ;;  %p2850_p9 = scmp.eq.s32.totalorder %s2435_s21, 0 }
  0x14   : > { %2868 = sst [smem:[#allocation17_spill]] %s2867_s28  ;;  %s2343_s30 = smov [#allocation5]  }
  0x15   : > { %p2463_p10 = pnand %p1646_p7, %p293_p8  ;;  %s321_s12 = sshll.u32 %s2343_s30, 4  ;;  %s322_s12 = int_to_ptr.vmem [resolvable:$true] %s321_s12 }
  0x16   : > { %s2344_s14 = smov [#allocation2]   ;;  %s2871_s3 = sld [smem:[#allocation18_spill]] }
  0x17   : > { %s2869_s29 = scalar_select %p2463_p10, 1, 0 }
  0x18   : > { %p2060_p11 = pneg %p2463_p10  ;;  %s305_s15 = sshll.u32 %s2344_s14, 4  ;;  %s2475_s15 = int_to_ptr.vmem [resolvable:$true] %s305_s15 }
  0x1a   : > { %p2471_p12 = pnand %p2850_p9, %p2060_p11 }
  0x1c   : > { %s2187_s24 = scalar_lea.hbm %s2871_s3, 2048  ;;  %p2485_p0 = pneg %p2471_p12 }
  0x1d   : > { %p2188_p13 = scmp.ne.s32.totalorder %s2871_s3, %s2187_s24  ;;  %p2194_p3 = scmp.lt.u32.totalorder %s2187_s24, %s2871_s3 }
  0x1f   : > { %p2190_p1 = pnand %p2485_p0, %p2188_p13 }
  0x21   : > { %p2191_p2 = pneg %p2190_p1 }
  0x23   : > { %p2196_p4 = pnand %p2194_p3, %p2191_p2 }
  0x25   : > { %2199 = shalt.err (!%p2196_p4)
}
  0x26   : > { %s2200_s16 = scalar_lea.vmem %s322_s12, 2048  ;;  %p2208_p9 = scmp.lt.s32.totalorder %s322_s12, %s322_s12 }
  0x27   : > { %p2201_p7 = scmp.ne.s32.totalorder %s322_s12, %s2200_s16  ;;  %p2209_p6 = scmp.lt.s32.totalorder %s2200_s16, %s2200_s16 }
  0x29   : > { %p2203_p8 = pnand %p2201_p7, %p2485_p0  ;;  %p2210_p5 = por %p2209_p6, %p2208_p9 }
  0x2b   : > { %p2204_p11 = pneg %p2203_p8 }
  0x2d   : > { %p2211_p10 = pnand %p2210_p5, %p2204_p11 }
  0x2f   : > { %2214 = shalt.err (!%p2211_p10)
}
  0x30   : > { %s2858_s26 = smov 64   ;;  %s2859_s22 = smov 4  }
  0x31   : > { %2066 = dma.hbm_to_vmem [thread:$0]  (!%p2471_p12), %s2871_s3, 2048, %s322_s12, [#allocation6], %s2858_s26, %s2858_s26, %s2859_s22  }
  0x32   : > { %s2215_s23 = scalar_lea.hbm %s2838_s1, 2048 }
  0x33   : > { %p2216_p5 = scmp.ne.s32.totalorder %s2838_s1, %s2215_s23  ;;  %p2222_p10 = scmp.lt.u32.totalorder %s2215_s23, %s2838_s1 }
  0x35   : > { %p2218_p6 = pnand %p2216_p5, %p2485_p0 }
  0x37   : > { %p2219_p9 = pneg %p2218_p6 }
  0x39   : > { %p2224_p13 = pnand %p2222_p10, %p2219_p9 }
  0x3b   : > { %2227 = shalt.err (!%p2224_p13)
}
  0x3c   : > { %s2228_s12 = scalar_lea.vmem %s2475_s15, 2048  ;;  %p2236_p4 = scmp.lt.s32.totalorder %s2475_s15, %s2475_s15 }
  0x3d   : > { %p2229_p1 = scmp.ne.s32.totalorder %s2475_s15, %s2228_s12  ;;  %p2237_p7 = scmp.lt.s32.totalorder %s2228_s12, %s2228_s12 }
  0x3f   : > { %p2231_p2 = pnand %p2229_p1, %p2485_p0  ;;  %p2238_p8 = por %p2237_p7, %p2236_p4 }
  0x41   : > { %p2232_p3 = pneg %p2231_p2 }
  0x43   : > { %p2239_p11 = pnand %p2238_p8, %p2232_p3 }
  0x45   : > { %2242 = shalt.err (!%p2239_p11)
}
  0x46   : > { %s2347_s28 = smov 128   ;;  %s2348_s17 = smov 8  }
  0x47   : > { %2063 = dma.hbm_to_vmem [thread:$0]  (!%p2471_p12), %s2838_s1, 2048, %s2475_s15, [#allocation3], %s2347_s28, %s2347_s28, %s2348_s17  }
  0x48   : > { %s2349_s19 = smov [#allocation7]   ;;  %s2243_s16 = scalar_lea.hbm %s2842_s5, 1024 }
  0x49   : > { %s337_s24 = sshll.u32 %s2349_s19, 4  ;;  %p2244_p5 = scmp.ne.s32.totalorder %s2842_s5, %s2243_s16  ;;  %s338_s24 = int_to_ptr.vmem [resolvable:$true] %s337_s24 }
  0x4a   : > { %p2250_p10 = scmp.lt.u32.totalorder %s2243_s16, %s2842_s5 }
  0x4b   : > { %p2246_p6 = pnand %p2244_p5, %p2485_p0 }
  0x4d   : > { %p2247_p9 = pneg %p2246_p6 }
  0x4f   : > { %p2252_p13 = pnand %p2250_p10, %p2247_p9 }
  0x51   : > { %2255 = shalt.err (!%p2252_p13)
}
  0x52   : > { %s2256_s15 = scalar_lea.vmem %s338_s24, 1024  ;;  %p2264_p4 = scmp.lt.s32.totalorder %s338_s24, %s338_s24 }
  0x53   : > { %p2257_p1 = scmp.ne.s32.totalorder %s338_s24, %s2256_s15  ;;  %p2265_p7 = scmp.lt.s32.totalorder %s2256_s15, %s2256_s15 }
  0x55   : > { %p2259_p2 = pnand %p2257_p1, %p2485_p0  ;;  %p2266_p8 = por %p2265_p7, %p2264_p4 }
  0x57   : > { %p2260_p3 = pneg %p2259_p2 }
  0x59   : > { %p2267_p11 = pnand %p2266_p8, %p2260_p3 }
  0x5b   : > { %2270 = shalt.err (!%p2267_p11)
}
  0x5c   : > { %s2873_s26 = smov 4   ;;  %s2874_s28 = smov 64  }
  0x5d   : > { %2069 = dma.hbm_to_vmem [thread:$0]  (!%p2471_p12), %s2842_s5, 1024, %s338_s24, [#allocation6], %s2874_s28, %s2874_s28, %s2873_s26  }
  0x5e   : > { %p2875_p5 = scmp.ne.s32.totalorder %s2869_s29, 0 }
  0x5f   : > { %p2876_p0 = scmp.eq.s32.totalorder (!%p2875_p5), %s2435_s21, 0 }
  0x60   : > { %377 = sbr.rel (%p2875_p5) target bundleno = 1721 (0x6b9), region = 64 }
  0x67   : > { %2316 = dma.done.wait (%p2876_p0), [#allocation3], 2048   ;;  %p2877_p6 = pmov %p2876_p0 }
  0x68   : > { %p2878_p9 = pmov %p2876_p0 }
  0x69   : > { %2318 = vsyncadd (%p2877_p6), [#allocation3], 4294965248 }
  0x6a   : > { %2320 = dma.done.wait (%p2878_p9), [#allocation6], 3072   ;;  %p2879_p10 = pmov %p2876_p0 }
  0x6b   : > { %v2350_v0 = vmov 0   ;;  %v2123_v1 = vld [vmem:[#allocation2 + $0x4] ss:$8 sps:$4 sm:$0xff]   ;;  %v2125_v2 = vld [vmem:[#allocation2] ss:$8 sps:$4 sm:$0xff]   ;;  %s1656_s29 = sshll.u32 %s2435_s21, 3  ;;  %v463_v48 = vlaneseq }
  0x6c   : > { %2322 = vsyncadd (%p2879_p10), [#allocation6], 4294964224  ;;  %585 = vmatprep.mubr.bf16.mxu0 %v2350_v0  ;;  %553 = vmatprep.subr.bf16.mxu0 %v2123_v1  ;;  %v2126_v3 = vld [vmem:[#allocation2 + $0x14] ss:$8 sps:$4 sm:$0xff]   ;;  %v2128_v4 = vld [vmem:[#allocation2 + $0x10] ss:$8 sps:$4 sm:$0xff]  }
  0x6d   : > { %554 = vmatpush1.bf16.msra.mxu0 %v2125_v2  ;;  %v2129_v5 = vld [vmem:[#allocation2 + $0x24] ss:$8 sps:$4 sm:$0xff]   ;;  %v2131_v6 = vld [vmem:[#allocation2 + $0x20] ss:$8 sps:$4 sm:$0xff]   ;;  %v2132_v7 = vld [vmem:[#allocation2 + $0x34] ss:$8 sps:$4 sm:$0xff]  }
  0x6e   : > { %555 = vmatprep.subr.bf16.mxu0 %v2126_v3  ;;  %p426_p12 = scmp.lt.s32.totalorder %s1656_s29, 15  ;;  %v2134_v8 = vld [vmem:[#allocation2 + $0x30] ss:$8 sps:$4 sm:$0xff]   ;;  %v2135_v9 = vld [vmem:[#allocation2 + $0x44] ss:$8 sps:$4 sm:$0xff]   ;;  %v464_v49 = vshrl.u32 %v463_v48, 7 }
  0x6f   : > { %v2137_v10 = vld [vmem:[#allocation2 + $0x40] ss:$8 sps:$4 sm:$0xff]   ;;  %v2138_v11 = vld [vmem:[#allocation2 + $0x54] ss:$8 sps:$4 sm:$0xff]   ;;  %v2140_v17 = vld [vmem:[#allocation2 + $0x50] ss:$8 sps:$4 sm:$0xff]  }
  0x70   : > { %s2891_s29 = smov (!%p426_p12, %s1656_s29), 15  ;;  %v2147_v12 = vld [vmem:[#allocation5 + $0x40] sm:$0xff]   ;;  %v2149_v14 = vld [vmem:[#allocation5 + $0x48] sm:$0xff]   ;;  %v2151_v16 = vld [vmem:[#allocation5 + $0x50] sm:$0xff]   ;;  %v465_v50 = vsub.s32 0, %v464_v49  ;;  %v469_v52 = vsub.s32 1, %v464_v49 }
  0x71   : > { %556 = vmatpush1.bf16.msra.mxu0 %v2128_v4  ;;  %v2148_v13 = vld [vmem:[#allocation5] sm:$0xff]   ;;  %1724 = vmatprep.subr.bf16.mxu1 %v2147_v12  ;;  %v2150_v15 = vld [vmem:[#allocation5 + $0x8] sm:$0xff]   ;;  %s1657_s13 = sshll.u32 %s2891_s29, 3  ;;  %v2152_v19 = vld [vmem:[#allocation5 + $0x10] sm:$0xff]   ;;  %vm1104_vm0 = vcmask 64512   ;;  %s422_s12 = sand.u32 1, %s2333_s18  }
  0x72   : > { %557 = vmatprep.subr.bf16.mxu0 %v2129_v5  ;;  %1725 = vmatpush3.bf16.msra.mxu1 %v2148_v13  ;;  %v2141_v18 = vld [vmem:[#allocation2 + $0x64] ss:$8 sps:$4 sm:$0xff]   ;;  %s2563_s20 = scalar_lea.vmem %s2837_s0, %s1657_s13  ;;  %v2153_v20 = vld [vmem:[#allocation5 + $0x58] sm:$0xff]   ;;  %v2143_v21 = vld [vmem:[#allocation2 + $0x60] ss:$8 sps:$4 sm:$0xff]   ;;  %s1655_s28 = sshll.u32 %s422_s12, 6 }
  0x73   : > { %1726 = vmatprep.subr.bf16.mxu1 %v2149_v14  ;;  %v2144_v22 = vld [vmem:[#allocation2 + $0x74] ss:$8 sps:$4 sm:$0xff]   ;;  %v2146_v23 = vld [vmem:[#allocation2 + $0x70] ss:$8 sps:$4 sm:$0xff]   ;;  %v2566_v24 = vld [vmem:[%s2563_s20] sm:$0xff]  ;;  %s2771_s29 = scalar_lea.vmem [#allocation8], %s1655_s28 }
  0x74   : > { %v2569_v25 = vld [vmem:[%s2563_s20 + $0x8] sm:$0xff]  ;;  %v2154_v26 = vld [vmem:[#allocation5 + $0x18] sm:$0xff]   ;;  %v2155_v27 = vld [vmem:[#allocation5 + $0x60] sm:$0xff]   ;;  %s1723_s13 = sshll.u32 %s2435_s21, 10  ;;  %s1552_s30 = sshll.u32 %s2771_s29, 4  ;;  %s2790_s30 = int_to_ptr.vmem [resolvable:$true] %s1552_s30 }
  0x75   : > { %558 = vmatpush1.bf16.msra.mxu0 %v2131_v6  ;;  %v2156_v28 = vld [vmem:[#allocation5 + $0x20] sm:$0xff]   ;;  %v2157_v29 = vld [vmem:[#allocation5 + $0x68] sm:$0xff]   ;;  %v441_v30 = vpack.c.bf16 %v2569_v25, %v2566_v24  ;;  %v2575_v32 = vld [vmem:[%s2563_s20 + $0x10] sm:$0xff]  ;;  %s2788_s23 = scalar_lea.hbm %s2848_s11, %s1723_s13  ;;  %s2796_s21 = scalar_lea.sflag [#allocation4], %s422_s12 }
  0x76   : > { %559 = vmatprep.subr.bf16.mxu0 %v2132_v7  ;;  %1727 = vmatpush3.bf16.msra.mxu1 %v2150_v15  ;;  %v2158_v31 = vld [vmem:[#allocation5 + $0x28] sm:$0xff]   ;;  %v2578_v33 = vld [vmem:[%s2563_s20 + $0x18] sm:$0xff]  ;;  %v2584_v35 = vld [vmem:[%s2563_s20 + $0x20] sm:$0xff]  ;;  %s2271_s19 = scalar_lea.vmem %s2790_s30, 1024  ;;  %p2880_p1 = scmp.ne.s32.totalorder %s2866_s27, 0 }
  0x77   : > { %1728 = vmatprep.subr.bf16.mxu1 %v2151_v16  ;;  %v442_v34 = vpack.c.bf16 %v2578_v33, %v2575_v32  ;;  %v2587_v36 = vld [vmem:[%s2563_s20 + $0x28] sm:$0xff]  ;;  %v2593_v38 = vld [vmem:[%s2563_s20 + $0x30] sm:$0xff]  ;;  %v2596_v39 = vld [vmem:[%s2563_s20 + $0x38] sm:$0xff]  ;;  %p2272_p13 = scmp.ne.s32.totalorder %s2790_s30, %s2271_s19  ;;  %s2351_s24 = smov [#allocation8]  }
  0x78   : > { %v443_v37 = vpack.c.bf16 %v2587_v36, %v2584_v35  ;;  %v444_v40 = vpack.c.bf16 %v2596_v39, %v2593_v38  ;;  %v2159_v41 = vld [vmem:[#allocation5 + $0x70] sm:$0xff]   ;;  %v2161_v43 = vld [vmem:[#allocation5 + $0x78] sm:$0xff]   ;;  %v2163_v45 = vld [vmem:[#allocation7] sm:$0xff]   ;;  %s2275_s25 = sshll.u32 %s2351_s24, 4  ;;  %s2276_s25 = int_to_ptr.vmem [resolvable:$false] %s2275_s25 }
  0x79   : > { %560 = vmatpush1.bf16.msra.mxu0 %v2134_v8  ;;  %v2160_v42 = vld [vmem:[#allocation5 + $0x30] sm:$0xff]   ;;  %v2162_v44 = vld [vmem:[#allocation5 + $0x38] sm:$0xff]   ;;  %v2164_v46 = vld [vmem:[#allocation7 + $0x8] sm:$0xff]   ;;  %p2273_p2 = pnand %p2272_p13, %p2880_p1  ;;  %s2277_s14 = scalar_lea.vmem %s2276_s25, 2048 }
  0x7a   : > { %561 = vmatprep.subr.bf16.mxu0 %v2135_v9  ;;  %1729 = vmatpush3.bf16.msra.mxu1 %v2152_v19  ;;  %v2165_v47 = vld [vmem:[#allocation7 + $0x10] sm:$0xff]   ;;  %v461_v51 = vld [vmem:[%s2839_s2] sm:$0x3]  ;;  %v985_v48 = vld [vmem:[%s2844_s7 + $0x18] sm:$0xff]  ;;  %p2278_p4 = scmp.lt.s32.totalorder %s2790_s30, %s2276_s25  ;;  %p2279_p7 = scmp.lt.s32.totalorder %s2277_s14, %s2271_s19 }
  0x7b   : > { %1730 = vmatprep.subr.bf16.mxu1 %v2153_v20  ;;  %v466_v53 = vrot.slane %v461_v51, %v465_v50  ;;  %v470_v55 = vrot.slane %v461_v51, %v469_v52  ;;  %v986_v50 = vld [vmem:[%s2844_s7 + $0x20] sm:$0xff]  ;;  %v987_v51 = vld [vmem:[%s2844_s7 + $0x28] sm:$0xff]  ;;  %p2274_p3 = pneg %p2273_p2 }
  0x7c   : > { %v2628_v52 = vpack.c.bf16 %v987_v51, %v986_v50  ;;  %p2280_p8 = por %p2279_p7, %p2278_p4 }
  0x7d   : > { %562 = vmatpush1.bf16.msra.mxu0 %v2137_v10 }
  0x7e   : > { %563 = vmatprep.subr.bf16.mxu0 %v2138_v11  ;;  %1731 = vmatpush3.bf16.msra.mxu1 %v2154_v26  ;;  %p2281_p11 = pnand %p2280_p8, %p2274_p3 }
  0x7f   : > { %1732 = vmatprep.subr.bf16.mxu1 %v2155_v27 }
  0x81   : > { %564 = vmatpush1.bf16.msra.mxu0 %v2140_v17 }
  0x82   : > { %565 = vmatprep.subr.bf16.mxu0 %v2141_v18  ;;  %1733 = vmatpush3.bf16.msra.mxu1 %v2156_v28 }
  0x83   : > { %1734 = vmatprep.subr.bf16.mxu1 %v2157_v29 }
  0x85   : > { %566 = vmatpush1.bf16.msra.mxu0 %v2143_v21 }
  0x86   : > { %567 = vmatprep.subr.bf16.mxu0 %v2144_v22  ;;  %1735 = vmatpush3.bf16.msra.mxu1 %v2158_v31 }
  0x87   : > { %1736 = vmatprep.subr.bf16.mxu1 %v2159_v41  ;;  %v2168_v41 = vld [vmem:[#allocation7 + $0x28] sm:$0xff]  }
  0x89   : > { %568 = vmatpush1.bf16.msra.mxu0 %v2146_v23 }
  0x8a   : > { %1737 = vmatpush3.bf16.msra.mxu1 %v2160_v42  ;;  %1842 = vmatprep.subr.bf16.mxu0 %v2163_v45  ;;  %v2169_v42 = vld [vmem:[#allocation7 + $0x30] sm:$0xff]  }
  0x8b   : > { %1738 = vmatprep.subr.bf16.mxu1 %v2161_v43  ;;  %v2170_v43 = vld [vmem:[#allocation7 + $0x38] sm:$0xff]  }
  0x8c   : > { %586 = vmatmul.mubr.bf16.vlgmr.msra.gmra.mrb[0].mxu0 %v441_v30 }
  0x8d   : > { %595 = vmatprep.mubr.bf16.mxu0 %v2350_v0  ;;  %1843 = vmatpush3.bf16.msra.mxu0 %v2163_v45  ;;  %v983_v45 = vld [vmem:[%s2844_s7 + $0x8] sm:$0xff] }
  0x8e   : > { %1739 = vmatpush3.bf16.msra.mxu1 %v2162_v44  ;;  %1844 = vmatprep.subr.bf16.mxu0 %v2164_v46  ;;  %v982_v44 = vld [vmem:[%s2844_s7] sm:$0xff] }
  0x91   : > { %1845 = vmatpush3.bf16.msra.mxu0 %v2164_v46  ;;  %v984_v46 = vld [vmem:[%s2844_s7 + $0x10] sm:$0xff] }
  0x92   : > { %1846 = vmatprep.subr.bf16.mxu0 %v2165_v47  ;;  %v2617_v49 = vpack.c.bf16 %v985_v48, %v984_v46 }
  0x94   : > { %596 = vmatmul.mubr.bf16.gmra.mrb[4].mxu0 %v442_v34 }
  0x95   : > { %605 = vmatprep.mubr.bf16.mxu0 %v2350_v0  ;;  %1847 = vmatpush3.bf16.msra.mxu0 %v2165_v47  ;;  %v2612_v47 = vpack.c.bf16 %v983_v45, %v982_v44 }
  0x97   : > { %1983 = vmatprep.subr.bf16.mxu1 %v2612_v47 }
  0x9c   : > { %606 = vmatmul.mubr.bf16.gmra.mrb[8].mxu0 %v443_v37  ;;  %v2166_v37 = vld [vmem:[#allocation7 + $0x18] sm:$0xff]  }
  0x9d   : > { %615 = vmatprep.mubr.bf16.mxu0 %v2350_v0  ;;  %1848 = vmatprep.subr.bf16.mxu0 %v2166_v37 }
  0x9e   : > { %1849 = vmatpush3.bf16.msra.mxu0 %v2166_v37 }
  0xa4   : > { %616 = vmatmul.mubr.bf16.gmra.mrb[12].mxu0 %v444_v40  ;;  %v2167_v40 = vld [vmem:[#allocation7 + $0x20] sm:$0xff]  }
  0xa5   : > { %1850 = vmatprep.subr.bf16.mxu0 %v2167_v40 }
  0xa6   : > { %1851 = vmatpush3.bf16.msra.mxu0 %v2167_v40 }
  0xa7   : > { %1852 = vmatprep.subr.bf16.mxu0 %v2168_v41 }
  0xaa   : > { %1853 = vmatpush3.bf16.msra.mxu0 %v2168_v41 }
  0xab   : > { %1854 = vmatprep.subr.bf16.mxu0 %v2169_v42 }
  0xae   : > { %1855 = vmatpush3.bf16.msra.mxu0 %v2169_v42 }
  0xaf   : > { %1856 = vmatprep.subr.bf16.mxu0 %v2170_v43 }
  0xb2   : > { %1857 = vmatpush3.bf16.msra.mxu0 %v2170_v43 }
 0x15f   : > { %v587_v54 = vpop.f32.mrb[0].mxu0 }
 0x160   : > { %v589_v56 = vpop.f32.mrb[1].mxu0  ;;  %v588_v58 = vadd.f32 %v587_v54, %v466_v53  ;;  %v989_v54 = vld [vmem:[%s2844_s7 + $0x38] sm:$0xff] }
 0x161   : > { %v591_v57 = vpop.f32.mrb[2].mxu0  ;;  %v590_v61 = vadd.f32 %v589_v56, %v470_v55  ;;  %v990_v56 = vld [vmem:[%s2844_s7 + $0x40] sm:$0xff] }
 0x162   : > { %v592_v59 = vadd.f32 %v591_v57, %v466_v53  ;;  %v593_v60 = vpop.f32.mrb[3].mxu0  ;;  %v991_v57 = vld [vmem:[%s2844_s7 + $0x48] sm:$0xff] }
 0x163   : > { %v594_v62 = vadd.f32 %v593_v60, %v470_v55  ;;  %v993_v60 = vld [vmem:[%s2844_s7 + $0x58] sm:$0xff] }
 0x164   : > { %v626_v63 = vpack.c.bf16 %v592_v59, %v588_v58  ;;  %v2648_v58 = vpack.c.bf16 %v991_v57, %v990_v56  ;;  %v992_v59 = vld [vmem:[%s2844_s7 + $0x50] sm:$0xff] }
 0x165   : > { %v627_v0 = vpack.c.bf16 %v594_v62, %v590_v61  ;;  %v2658_v61 = vpack.c.bf16 %v993_v60, %v992_v59  ;;  %v994_v62 = vld [vmem:[%s2844_s7 + $0x60] sm:$0xff] }
 0x167   : > { %v597_v1 = vpop.f32.mrb[4].mxu0  ;;  %801 = vmatprep.mubr.bf16.mxu1 %v627_v0 }
 0x168   : > { %v599_v2 = vpop.f32.mrb[5].mxu0  ;;  %802 = vmatmul.mubr.bf16.vlgmr.msra.gmra.mrb[0].mxu1 %v626_v63  ;;  %v598_v4 = vadd.f32 %v597_v1, %v466_v53  ;;  %v995_v63 = vld [vmem:[%s2844_s7 + $0x68] sm:$0xff] }
 0x169   : > { %v601_v3 = vpop.f32.mrb[6].mxu0  ;;  %v600_v7 = vadd.f32 %v599_v2, %v470_v55  ;;  %1985 = vmatpush3.bf16.msra.mxu1 %v2612_v47  ;;  %v2668_v0 = vpack.c.bf16 %v995_v63, %v994_v62  ;;  %v1674_v2 = vld [vmem:[%s2841_s4] ss:$0 sm:$0xff] }
 0x16a   : > { %v602_v5 = vadd.f32 %v601_v3, %v466_v53  ;;  %v603_v6 = vpop.f32.mrb[7].mxu0  ;;  %1987 = vmatprep.subr.bf16.mxu1 %v2617_v49 }
 0x16b   : > { %v604_v8 = vadd.f32 %v603_v6, %v470_v55 }
 0x16c   : > { %v628_v9 = vpack.c.bf16 %v602_v5, %v598_v4 }
 0x16d   : > { %v629_v10 = vpack.c.bf16 %v604_v8, %v600_v7  ;;  %1989 = vmatpush3.bf16.msra.mxu1 %v2617_v49 }
 0x16e   : > { %1991 = vmatprep.subr.bf16.mxu1 %v2628_v52 }
 0x16f   : > { %v607_v11 = vpop.f32.mrb[8].mxu0  ;;  %809 = vmatprep.mubr.bf16.mxu1 %v629_v10 }
 0x170   : > { %v609_v12 = vpop.f32.mrb[9].mxu0  ;;  %810 = vmatmul.mubr.bf16.gmra.mrb[4].mxu1 %v628_v9  ;;  %v608_v14 = vadd.f32 %v607_v11, %v466_v53 }
 0x171   : > { %v611_v13 = vpop.f32.mrb[10].mxu0  ;;  %v610_v17 = vadd.f32 %v609_v12, %v470_v55  ;;  %1993 = vmatpush3.bf16.msra.mxu1 %v2628_v52 }
 0x172   : > { %v612_v15 = vadd.f32 %v611_v13, %v466_v53  ;;  %v613_v16 = vpop.f32.mrb[11].mxu0 }
 0x173   : > { %v614_v18 = vadd.f32 %v613_v16, %v470_v55 }
 0x174   : > { %v630_v19 = vpack.c.bf16 %v612_v15, %v608_v14 }
 0x175   : > { %v631_v20 = vpack.c.bf16 %v614_v18, %v610_v17 }
 0x177   : > { %v617_v21 = vpop.f32.mrb[12].mxu0  ;;  %817 = vmatprep.mubr.bf16.mxu1 %v631_v20 }
 0x178   : > { %v619_v22 = vpop.f32.mrb[13].mxu0  ;;  %818 = vmatmul.mubr.bf16.gmra.mrb[8].mxu1 %v630_v19  ;;  %v618_v26 = vadd.f32 %v617_v21, %v466_v53 }
 0x179   : > { %v621_v23 = vpop.f32.mrb[14].mxu0  ;;  %v620_v29 = vadd.f32 %v619_v22, %v470_v55 }
 0x17a   : > { %v622_v27 = vadd.f32 %v621_v23, %v466_v53  ;;  %v623_v28 = vpop.f32.mrb[15].mxu0  ;;  %v988_v53 = vld [vmem:[%s2844_s7 + $0x30] sm:$0xff] }
 0x17b   : > { %v624_v30 = vadd.f32 %v623_v28, %v470_v55  ;;  %v2638_v55 = vpack.c.bf16 %v989_v54, %v988_v53 }
 0x17c   : > { %v632_v31 = vpack.c.bf16 %v622_v27, %v618_v26 }
 0x17d   : > { %v633_v34 = vpack.c.bf16 %v624_v30, %v620_v29  ;;  %1995 = vmatprep.subr.bf16.mxu1 %v2638_v55 }
 0x17e   : > { %1997 = vmatpush3.bf16.msra.mxu1 %v2638_v55 }
 0x17f   : > { %825 = vmatprep.mubr.bf16.mxu1 %v633_v34  ;;  %1999 = vmatprep.subr.bf16.mxu1 %v2648_v58 }
 0x180   : > { %826 = vmatmul.mubr.bf16.gmra.mrb[12].mxu1 %v632_v31 }
 0x182   : > { %2001 = vmatpush3.bf16.msra.mxu1 %v2648_v58 }
 0x183   : > { %2003 = vmatprep.subr.bf16.mxu1 %v2658_v61 }
 0x186   : > { %2005 = vmatpush3.bf16.msra.mxu1 %v2658_v61 }
 0x187   : > { %2007 = vmatprep.subr.bf16.mxu1 %v2668_v0 }
 0x18a   : > { %2009 = vmatpush3.bf16.msra.mxu1 %v2668_v0 }
 0x23b   : > { %v1740_v1 = vpop.f32.mrb[0].mxu1 }
 0x23c   : > { %v1741_v3 = vpop.f32.mrb[1].mxu1 }
 0x23d   : > { %v1742_v4 = vadd.f32 %v1741_v3, %v1740_v1  ;;  %v1743_v5 = vpop.f32.mrb[2].mxu1 }
 0x23e   : > { %v1744_v6 = vpop.f32.mrb[3].mxu1 }
 0x23f   : > { %v804_v7 = vadd.f32 %v1742_v4, %v1674_v2  ;;  %v1745_v8 = vadd.f32 %v1744_v6, %v1743_v5 }
 0x241   : > { %v807_v9 = vadd.f32 %v1745_v8, %v1674_v2  ;;  %v834_v10 = vmul.f32 %v804_v7, %v2566_v24 }
 0x243   : > { %v835_v11 = vmul.f32 %v807_v9, %v2569_v25  ;;  %v1746_v12 = vpop.f32.mrb[4].mxu1 }
 0x244   : > { %v1747_v13 = vpop.f32.mrb[5].mxu1 }
 0x245   : > { %v1748_v14 = vadd.f32 %v1747_v13, %v1746_v12  ;;  %v1749_v15 = vpop.f32.mrb[6].mxu1  ;;  %v842_v16 = vpack.c.bf16 %v835_v11, %v834_v10 }
 0x246   : > { %v1750_v17 = vpop.f32.mrb[7].mxu1 }
 0x247   : > { %v812_v18 = vadd.f32 %v1748_v14, %v1674_v2  ;;  %v1751_v19 = vadd.f32 %v1750_v17, %v1749_v15  ;;  %1858 = vmatprep.mubr.bf16.mxu0 %v842_v16 }
 0x249   : > { %v815_v20 = vadd.f32 %v1751_v19, %v1674_v2  ;;  %v836_v21 = vmul.f32 %v812_v18, %v2575_v32 }
 0x24b   : > { %v837_v22 = vmul.f32 %v815_v20, %v2578_v33  ;;  %v1752_v23 = vpop.f32.mrb[8].mxu1 }
 0x24c   : > { %v1753_v26 = vpop.f32.mrb[9].mxu1 }
 0x24d   : > { %v843_v27 = vpack.c.bf16 %v837_v22, %v836_v21  ;;  %v1754_v24 = vadd.f32 %v1753_v26, %v1752_v23  ;;  %v1755_v28 = vpop.f32.mrb[10].mxu1 }
 0x24e   : > { %v1756_v25 = vpop.f32.mrb[11].mxu1 }
 0x24f   : > { %v820_v29 = vadd.f32 %v1754_v24, %v1674_v2  ;;  %v1757_v30 = vadd.f32 %v1756_v25, %v1755_v28  ;;  %1859 = vmatmul.mubr.bf16.vlgmr.msra.gmra.mrb[16].mxu0 %v843_v27 }
 0x251   : > { %v823_v31 = vadd.f32 %v1757_v30, %v1674_v2  ;;  %v838_v34 = vmul.f32 %v820_v29, %v2584_v35  ;;  %v996_v35 = vld [vmem:[%s2844_s7 + $0x70] sm:$0xff] }
 0x253   : > { %v839_v37 = vmul.f32 %v823_v31, %v2587_v36  ;;  %v1758_v40 = vpop.f32.mrb[12].mxu1  ;;  %v997_v36 = vld [vmem:[%s2844_s7 + $0x78] sm:$0xff] }
 0x254   : > { %v1759_v41 = vpop.f32.mrb[13].mxu1  ;;  %v2010_v53 = vpack.c.bf16 %v997_v36, %v996_v35 }
 0x255   : > { %v1760_v42 = vadd.f32 %v1759_v41, %v1758_v40  ;;  %v1761_v32 = vpop.f32.mrb[14].mxu1  ;;  %v844_v43 = vpack.c.bf16 %v839_v37, %v838_v34 }
 0x256   : > { %v1762_v33 = vpop.f32.mrb[15].mxu1  ;;  %2011 = vmatprep.subr.bf16.mxu1 %v2010_v53 }
 0x257   : > { %v828_v44 = vadd.f32 %v1760_v42, %v1674_v2  ;;  %v1763_v45 = vadd.f32 %v1762_v33, %v1761_v32  ;;  %1862 = vmatprep.mubr.bf16.mxu0 %v844_v43  ;;  %2013 = vmatpush3.bf16.msra.mxu1 %v2010_v53 }
 0x258   : > { %2015 = vmatprep.subr.bf16.mxu1 %v2612_v47 }
 0x259   : > { %v831_v46 = vadd.f32 %v1763_v45, %v1674_v2  ;;  %v840_v48 = vmul.f32 %v828_v44, %v2593_v38  ;;  %v1103_v38 = vld [vmem:[%s2845_s8] sm:$0xff] }
 0x25a   : > { %1910 = vmatprep.subr.mxu0 %v1103_v38 }
 0x25b   : > { %v841_v50 = vmul.f32 %v831_v46, %v2596_v39  ;;  %1911 = vmatpush3.msra.mxu0 %v1103_v38  ;;  %v1691_v39 = vld [vmem:[%s2843_s6] ss:$0 sm:$0xff] }
 0x25c   : > { %1968 = vmatprep.subr.mxu0 %v1103_v38 }
 0x25d   : > { %v845_v51 = vpack.c.bf16 %v841_v50, %v840_v48 }
 0x25f   : > { %1863 = vmatmul.mubr.bf16.gmra.mrb[20].mxu0 %v845_v51 }
 0x322   : > { %v1860_v54 = vpop.f32.mrb[16].mxu0 }
 0x323   : > { %v951_v56 = vpop.f32.mrb[17].mxu0  ;;  %v960_v63 = vadd.f32 %v1860_v54, %v1691_v39 }
 0x324   : > { %v952_v57 = vadd.f32 %v1691_v39, %v951_v56  ;;  %v1861_v59 = vpop.f32.mrb[18].mxu0  ;;  %v1716_v56 = vld [vmem:[%s2846_s9] ss:$0 sm:$0xff] }
 0x325   : > { %v954_v60 = vpop.f32.mrb[19].mxu0  ;;  %v963_v1 = vadd.f32 %v1861_v59, %v1691_v39 }
 0x326   : > { %v955_v62 = vadd.f32 %v1691_v39, %v954_v60  ;;  %1898 = vmatprep.mubr.f32.mxu1 %v952_v57  ;;  %v1717_v60 = vld [vmem:[%s2847_s10] ss:$0 sm:$0xff] }
 0x328   : > { %1899 = vmatmul.mubr.f32.vlgmr.msra.gmra.mrb[16].mxu1 %v955_v62 }
 0x329   : > { %1901 = vmatprep.mubr.f32.mxu1 %v960_v63  ;;  %2017 = vmatpush3.bf16.msra.mxu1 %v2612_v47 }
 0x32a   : > { %2019 = vmatprep.subr.bf16.mxu1 %v2617_v49 }
 0x32c   : > { %1902 = vmatmul.mubr.f32.gmra.mrb[18].mxu1 %v963_v1 }
 0x32d   : > { %2021 = vmatpush3.bf16.msra.mxu1 %v2617_v49 }
 0x32e   : > { %2023 = vmatprep.subr.bf16.mxu1 %v2628_v52 }
 0x331   : > { %2025 = vmatpush3.bf16.msra.mxu1 %v2628_v52 }
 0x332   : > { %v1864_v2 = vpop.f32.mrb[20].mxu0  ;;  %2027 = vmatprep.subr.bf16.mxu1 %v2638_v55 }
 0x333   : > { %v967_v3 = vpop.f32.mrb[21].mxu0  ;;  %v976_v7 = vadd.f32 %v1864_v2, %v1691_v39 }
 0x334   : > { %v968_v4 = vadd.f32 %v1691_v39, %v967_v3  ;;  %v1865_v5 = vpop.f32.mrb[22].mxu0 }
 0x335   : > { %v970_v6 = vpop.f32.mrb[23].mxu0  ;;  %2029 = vmatpush3.bf16.msra.mxu1 %v2638_v55  ;;  %v979_v49 = vadd.f32 %v1865_v5, %v1691_v39 }
 0x336   : > { %v971_v47 = vadd.f32 %v1691_v39, %v970_v6  ;;  %1904 = vmatprep.mubr.f32.mxu1 %v968_v4  ;;  %2031 = vmatprep.subr.bf16.mxu1 %v2648_v58 }
 0x338   : > { %1905 = vmatmul.mubr.f32.gmra.mrb[20].mxu1 %v971_v47 }
 0x339   : > { %1907 = vmatprep.mubr.f32.mxu1 %v976_v7  ;;  %2033 = vmatpush3.bf16.msra.mxu1 %v2648_v58 }
 0x33a   : > { %2035 = vmatprep.subr.bf16.mxu1 %v2658_v61 }
 0x33c   : > { %1908 = vmatmul.mubr.f32.gmra.mrb[22].mxu1 %v979_v49 }
 0x33d   : > { %2037 = vmatpush3.bf16.msra.mxu1 %v2658_v61 }
 0x33e   : > { %2039 = vmatprep.subr.bf16.mxu1 %v2668_v0 }
 0x341   : > { %2041 = vmatpush3.bf16.msra.mxu1 %v2668_v0 }
 0x342   : > { %2043 = vmatprep.subr.bf16.mxu1 %v2010_v53 }
 0x345   : > { %2045 = vmatpush3.bf16.msra.mxu1 %v2010_v53 }
 0x3fb   : > { %v1900_v52 = vpop.f32.mrb[16].mxu1 }
 0x3fc   : > { %v1064_v55 = vpop.f32.mrb[17].mxu1 }
 0x3fd   : > { %1912 = vmatprep.mubr.msk.f32.mxu0 %vm1104_vm0, %v1064_v55 }
 0x3fe   : > { %1913 = vmatmul.mubr.msk.f32.vlgmr.msra.gmra.mrb[24].mxu0 %vm1104_vm0, %v1900_v52 }
 0x3ff   : > { %v1903_v58 = vpop.f32.mrb[18].mxu1  ;;  %1969 = vmatpush3.msra.mxu0 %v1103_v38 }
 0x400   : > { %v1074_v8 = vpop.f32.mrb[19].mxu1 }
 0x401   : > { %1915 = vmatprep.mubr.msk.f32.mxu0 %vm1104_vm0, %v1074_v8 }
 0x402   : > { %1916 = vmatmul.mubr.msk.f32.gmra.mrb[26].mxu0 %vm1104_vm0, %v1903_v58 }
 0x40b   : > { %v1906_v61 = vpop.f32.mrb[20].mxu1 }
 0x40c   : > { %v1084_v9 = vpop.f32.mrb[21].mxu1 }
 0x40d   : > { %1918 = vmatprep.mubr.msk.f32.mxu0 %vm1104_vm0, %v1084_v9 }
 0x40e   : > { %1919 = vmatmul.mubr.msk.f32.gmra.mrb[28].mxu0 %vm1104_vm0, %v1906_v61 }
 0x40f   : > { %v1909_v0 = vpop.f32.mrb[22].mxu1 }
 0x410   : > { %v1094_v10 = vpop.f32.mrb[23].mxu1 }
 0x411   : > { %1921 = vmatprep.mubr.msk.f32.mxu0 %vm1104_vm0, %v1094_v10 }
 0x412   : > { %1922 = vmatmul.mubr.msk.f32.gmra.mrb[30].mxu0 %vm1104_vm0, %v1909_v0 }
 0x4d1   : > { %v1914_v11 = vpop.f32.mrb[24].mxu0 }
 0x4d2   : > { %v2718_v12 = vsub.f32 %v955_v62, %v1914_v11  ;;  %v1195_v13 = vpop.f32.mrb[25].mxu0 }
 0x4d3   : > { %v2720_v14 = vsub.f32 %v952_v57, %v1195_v13 }
 0x4d4   : > { %v1243_v17 = vmul.f32 %v2718_v12, %v2718_v12 }
 0x4d5   : > { %v1242_v15 = vmul.f32 %v2720_v14, %v2720_v14  ;;  %v1917_v16 = vpop.f32.mrb[26].mxu0 }
 0x4d6   : > { %v2726_v18 = vsub.f32 %v963_v1, %v1917_v16  ;;  %v1205_v19 = vpop.f32.mrb[27].mxu0 }
 0x4d7   : > { %v2728_v20 = vsub.f32 %v960_v63, %v1205_v19  ;;  %1956 = vmatprep.mubr.f32.mxu1 %v1242_v15 }
 0x4d8   : > { %1957 = vmatmul.mubr.f32.vlgmr.msra.gmra.mrb[24].mxu1 %v1243_v17  ;;  %v1245_v22 = vmul.f32 %v2726_v18, %v2726_v18 }
 0x4d9   : > { %v1244_v21 = vmul.f32 %v2728_v20, %v2728_v20 }
 0x4db   : > { %1959 = vmatprep.mubr.f32.mxu1 %v1244_v21 }
 0x4dc   : > { %1960 = vmatmul.mubr.f32.gmra.mrb[26].mxu1 %v1245_v22 }
 0x4e1   : > { %v1920_v23 = vpop.f32.mrb[28].mxu0 }
 0x4e2   : > { %v2734_v26 = vsub.f32 %v971_v47, %v1920_v23  ;;  %v1215_v27 = vpop.f32.mrb[29].mxu0 }
 0x4e3   : > { %v2736_v24 = vsub.f32 %v968_v4, %v1215_v27 }
 0x4e4   : > { %v1247_v29 = vmul.f32 %v2734_v26, %v2734_v26 }
 0x4e5   : > { %v1246_v28 = vmul.f32 %v2736_v24, %v2736_v24  ;;  %v1923_v25 = vpop.f32.mrb[30].mxu0 }
 0x4e6   : > { %v2742_v30 = vsub.f32 %v979_v49, %v1923_v25  ;;  %v1225_v31 = vpop.f32.mrb[31].mxu0 }
 0x4e7   : > { %v2744_v34 = vsub.f32 %v976_v7, %v1225_v31  ;;  %1962 = vmatprep.mubr.f32.mxu1 %v1246_v28 }
 0x4e8   : > { %1963 = vmatmul.mubr.f32.gmra.mrb[28].mxu1 %v1247_v29  ;;  %v1249_v40 = vmul.f32 %v2742_v30, %v2742_v30 }
 0x4e9   : > { %v1248_v37 = vmul.f32 %v2744_v34, %v2744_v34 }
 0x4eb   : > { %1965 = vmatprep.mubr.f32.mxu1 %v1248_v37 }
 0x4ec   : > { %1966 = vmatmul.mubr.f32.gmra.mrb[30].mxu1 %v1249_v40 }
 0x5ab   : > { %v1958_v41 = vpop.f32.mrb[24].mxu1 }
 0x5ac   : > { %v1316_v42 = vpop.f32.mrb[25].mxu1 }
 0x5ad   : > { %1970 = vmatprep.mubr.msk.f32.mxu0 %vm1104_vm0, %v1316_v42 }
 0x5ae   : > { %1971 = vmatmul.mubr.msk.f32.vlgmr.msra.gmra.mrb[32].mxu0 %vm1104_vm0, %v1958_v41 }
 0x5af   : > { %v1961_v32 = vpop.f32.mrb[26].mxu1 }
 0x5b0   : > { %v1326_v43 = vpop.f32.mrb[27].mxu1 }
 0x5b1   : > { %1973 = vmatprep.mubr.msk.f32.mxu0 %vm1104_vm0, %v1326_v43 }
 0x5b2   : > { %1974 = vmatmul.mubr.msk.f32.gmra.mrb[34].mxu0 %vm1104_vm0, %v1961_v32 }
 0x5bb   : > { %v1964_v33 = vpop.f32.mrb[28].mxu1 }
 0x5bc   : > { %v1336_v44 = vpop.f32.mrb[29].mxu1 }
 0x5bd   : > { %1976 = vmatprep.mubr.msk.f32.mxu0 %vm1104_vm0, %v1336_v44 }
 0x5be   : > { %1977 = vmatmul.mubr.msk.f32.gmra.mrb[36].mxu0 %vm1104_vm0, %v1964_v33 }
 0x5bf   : > { %v1967_v45 = vpop.f32.mrb[30].mxu1 }
 0x5c0   : > { %v1346_v46 = vpop.f32.mrb[31].mxu1 }
 0x5c1   : > { %1979 = vmatprep.mubr.msk.f32.mxu0 %vm1104_vm0, %v1346_v46 }
 0x5c2   : > { %1980 = vmatmul.mubr.msk.f32.gmra.mrb[38].mxu0 %vm1104_vm0, %v1967_v45 }
 0x681   : > { %v1972_v48 = vpop.f32.mrb[32].mxu0 }
 0x682   : > { %v1451_v50 = vadd.f32 1e-05, %v1972_v48  ;;  %v1445_v51 = vpop.f32.mrb[33].mxu0 }
 0x683   : > { %v1446_v35 = vadd.f32 1e-05, %v1445_v51 }
 0x684   : > { %2171 = vrsqrt.f32 %v1451_v50 }
 0x685   : > { %2173 = vrsqrt.f32 %v1446_v35  ;;  %v1975_v36 = vpop.f32.mrb[34].mxu0 }
 0x686   : > { %v1461_v53 = vadd.f32 1e-05, %v1975_v36  ;;  %v1455_v38 = vpop.f32.mrb[35].mxu0 }
 0x687   : > { %v1456_v39 = vadd.f32 1e-05, %v1455_v38 }
 0x688   : > { %2175 = vrsqrt.f32 %v1461_v53 }
 0x689   : > { %2177 = vrsqrt.f32 %v1456_v39 }
 0x68e   : > { %v2172_v54 = vpop.eup %2171 }
 0x68f   : > { %v2174_v57 = vpop.eup %2173  ;;  %v1493_v59 = vmul.f32 %v2172_v54, %v2718_v12 }
 0x690   : > { %v1492_v62 = vmul.f32 %v2174_v57, %v2720_v14 }
 0x691   : > { %v1508_v63 = vmul.f32 %v1716_v56, %v1493_v59  ;;  %v1978_v1 = vpop.f32.mrb[36].mxu0 }
 0x692   : > { %v2176_v2 = vpop.eup %2175  ;;  %v1507_v3 = vmul.f32 %v1716_v56, %v1492_v62  ;;  %v1471_v4 = vadd.f32 1e-05, %v1978_v1  ;;  %v1465_v5 = vpop.f32.mrb[37].mxu0 }
 0x693   : > { %v2178_v6 = vpop.eup %2177  ;;  %v1523_v47 = vadd.f32 %v1717_v60, %v1508_v63  ;;  %v1495_v7 = vmul.f32 %v2176_v2, %v2726_v18  ;;  %v1466_v49 = vadd.f32 1e-05, %v1465_v5 }
 0x694   : > { %v1522_v52 = vadd.f32 %v1717_v60, %v1507_v3  ;;  %v1494_v55 = vmul.f32 %v2178_v6, %v2728_v20  ;;  %2179 = vrsqrt.f32 %v1471_v4 }
 0x695   : > { %1531 = vst [vmem:[%s2771_s29 + $0x8] sm:$0xff] %v1523_v47  ;;  %v1510_v58 = vmul.f32 %v1716_v56, %v1495_v7  ;;  %2181 = vrsqrt.f32 %v1466_v49  ;;  %v1981_v8 = vpop.f32.mrb[38].mxu0 }
 0x696   : > { %1530 = vst [vmem:[%s2771_s29] sm:$0xff] %v1522_v52  ;;  %v1509_v61 = vmul.f32 %v1716_v56, %v1494_v55  ;;  %v1481_v9 = vadd.f32 1e-05, %v1981_v8  ;;  %v1475_v0 = vpop.f32.mrb[39].mxu0 }
 0x697   : > { %v1525_v10 = vadd.f32 %v1717_v60, %v1510_v58  ;;  %v1476_v11 = vadd.f32 1e-05, %v1475_v0 }
 0x698   : > { %v1524_v12 = vadd.f32 %v1717_v60, %v1509_v61  ;;  %2183 = vrsqrt.f32 %v1481_v9 }
 0x699   : > { %1533 = vst [vmem:[%s2771_s29 + $0x18] sm:$0xff] %v1525_v10  ;;  %2185 = vrsqrt.f32 %v1476_v11 }
 0x69a   : > { %1532 = vst [vmem:[%s2771_s29 + $0x10] sm:$0xff] %v1524_v12 }
 0x69e   : > { %v2180_v13 = vpop.eup %2179 }
 0x69f   : > { %v2182_v14 = vpop.eup %2181  ;;  %v1497_v15 = vmul.f32 %v2180_v13, %v2734_v26 }
 0x6a0   : > { %v1496_v16 = vmul.f32 %v2182_v14, %v2736_v24 }
 0x6a1   : > { %v1512_v17 = vmul.f32 %v1716_v56, %v1497_v15 }
 0x6a2   : > { %v2184_v18 = vpop.eup %2183  ;;  %v1511_v19 = vmul.f32 %v1716_v56, %v1496_v16 }
 0x6a3   : > { %v2186_v20 = vpop.eup %2185  ;;  %v1527_v21 = vadd.f32 %v1717_v60, %v1512_v17  ;;  %v1499_v22 = vmul.f32 %v2184_v18, %v2742_v30 }
 0x6a4   : > { %v1526_v23 = vadd.f32 %v1717_v60, %v1511_v19  ;;  %v1498_v27 = vmul.f32 %v2186_v20, %v2744_v34 }
 0x6a5   : > { %1535 = vst [vmem:[%s2771_s29 + $0x28] sm:$0xff] %v1527_v21  ;;  %v1514_v26 = vmul.f32 %v1716_v56, %v1499_v22 }
 0x6a6   : > { %1534 = vst [vmem:[%s2771_s29 + $0x20] sm:$0xff] %v1526_v23  ;;  %v1513_v24 = vmul.f32 %v1716_v56, %v1498_v27 }
 0x6a7   : > { %v1529_v28 = vadd.f32 %v1717_v60, %v1514_v26 }
 0x6a8   : > { %v1528_v25 = vadd.f32 %v1717_v60, %v1513_v24 }
 0x6a9   : > { %1537 = vst [vmem:[%s2771_s29 + $0x38] sm:$0xff] %v1529_v28 }
 0x6aa   : > { %1536 = vst [vmem:[%s2771_s29 + $0x30] sm:$0xff] %v1528_v25 }
 0x6ab   : > { %2284 = shalt.err (!%p2281_p11)
}
 0x6ac   : > { %s2285_s16 = scalar_lea.hbm %s2788_s23, 1024  ;;  %s2289_s26 = scalar_lea.hbm %s2848_s11, 2048 }
 0x6ad   : > { %p2286_p5 = scmp.ne.s32.totalorder %s2788_s23, %s2285_s16  ;;  %p2290_p9 = scmp.lt.u32.totalorder %s2788_s23, %s2848_s11 }
 0x6ae   : > { %p2291_p10 = scmp.lt.u32.totalorder %s2289_s26, %s2285_s16  ;;  %p2293_p13 = scmp.lt.u32.totalorder %s2285_s16, %s2788_s23 }
 0x6af   : > { %p2287_p0 = pnand %p2286_p5, %p2880_p1 }
 0x6b0   : > { %p2292_p12 = por %p2291_p10, %p2290_p9 }
 0x6b1   : > { %p2288_p6 = pneg %p2287_p0 }
 0x6b2   : > { %p2294_p2 = por %p2293_p13, %p2292_p12 }
 0x6b4   : > { %p2295_p3 = pnand %p2294_p2, %p2288_p6 }
 0x6b6   : > { %2298 = shalt.err (!%p2295_p3)
}
 0x6b7   : > { %s2352_s22 = smov 128   ;;  %s2353_s29 = smov 8  }
 0x6b8   : > { %2058 = dma.vmem_to_hbm [thread:$0]  (%p2880_p1), %s2790_s30, 1024, %s2788_s23, %s2796_s21, %s2352_s22, %s2352_s22, %s2353_s29  }
 0x6b9 PF: > { %s2881_s13 = sld [smem:[#allocation14_spill]]  ;;  %s2882_s17 = sld [smem:[#allocation12_spill]] }
 0x6ba   : > { %s2883_s20 = sld [smem:[#allocation17_spill]] }
 0x6bf   : > { %p2080_p4 = scmp.ge.s32.totalorder %s2881_s13, 2  ;;  %s1567_s19 = sand.u32 1, %s2882_s17  }
 0x6c0   : > { %p2884_p7 = scmp.ne.s32.totalorder %s2883_s20, 0  ;;  %s1568_s24 = scalar_lea.sflag [#allocation4], %s1567_s19 }
 0x6c2   : > { %p2071_p8 = pnand %p2080_p4, %p2884_p7 }
 0x6c4   : > { %2324 = dma.done.wait (!%p2071_p8), %s1568_s24, 1024  }
 0x6c5   : > { %2326 = vsyncadd (!%p2071_p8), %s1568_s24, 4294966272  ;;  %s2885_s20 = sld [smem:[#allocation15_spill]]  ;;  %s2886_s25 = sld [smem:[#allocation13_spill]] }
 0x6c6   : > { %s2887_s19 = sld [smem:[#allocation16_spill]]  ;;  %s2888_s17 = smov %s2333_s18 }
 0x6cb   : > { %p23_p11 = scmp.ge.s32.totalorder %s2885_s20, 4   ;;  %s2889_s18 = smov %s2886_s25 }
 0x6cd   :  { %25 = sbr.rel (!%p23_p11) target bundleno = 7 (0x7), region = 112 }
 0x6d4   :  { %1573 = vsyncpa [#allocation3], 1 }
 0x6d5   :  { %1575 = vsyncpa [#allocation3 + $0x1], 1 }
 0x6d6   :  { %1576 = vsyncpa [#allocation6], 1 }
 0x6d7   :  { %1577 = vsyncpa [#allocation4], 1 }
 0x6d8   :  { %1579 = vsyncpa [#allocation4 + $0x1], 1 }

</bundles_post_ra>
